<compile_context>
chip_gen: v7x
topology: tpu7x:2x2x1
jax: 0.10.0
libtpu: 0.0.40
codegen_flags: <defaults>
</compile_context>

<pallas_src>
import math

import jax
import jax.numpy as jnp
from jax import lax
from jax.experimental import pallas as pl
from jax.experimental.pallas import tpu as pltpu

NUM_HEADS = 8          # nn.MultiheadAttention(embed_dim, 8)
LN_EPS = 1e-5          # nn.LayerNorm default eps


def _device_budget():
    """(vmem_limit_bytes, rows_target) tuned per TPU generation."""
    vmem_cap = None
    try:
        info = pltpu.get_tpu_info()
        vmem_cap = int(getattr(info, "vmem_capacity_bytes"))
    except Exception:
        vmem_cap = None
    if vmem_cap is not None and vmem_cap > 100 * 1024 * 1024:
        # v5e / v6e: 128 MiB physical VMEM -> big tiles, generous scoped limit.
        return 80 * 1024 * 1024, 1024
    # v7x (64 MiB physical) or unknown: keep headroom for double-buffering.
    return 40 * 1024 * 1024, 512


def make_sab_kernel(nb, L, E, num_heads):
    """Kernel processes a block of nb batches, folded to (nb*L, E) rows."""
    H = num_heads
    Dh = E // H

    def kernel(x_ref, wqkv_ref, bqkv_ref, wo_ref, bo_ref,
               wr_ref, br_ref, g_ref, beta_ref, o_ref):
        x = x_ref[...]                                    # (nb*L, E) f32
        xb = x.astype(jnp.bfloat16)                       # bf16 MXU operand

        # ---- fused QKV projection: one (rows,E) x (E,3E) matmul ----
        qkv = jnp.dot(xb, wqkv_ref[...],
                      preferred_element_type=jnp.float32) + bqkv_ref[...]
        q = qkv[:, :E].reshape(nb, L, E)                  # 32-lane-aligned splits
        k = qkv[:, E:2 * E].reshape(nb, L, E)
        v = qkv[:, 2 * E:].reshape(nb, L, E)

        # ---- head-major stacking: (nb, L, E) -> (H*nb, L, Dh) ----
        def to_heads(t):
            hs = [t[..., h * Dh:(h + 1) * Dh] for h in range(H)]
            return jnp.stack(hs, axis=0).reshape(H * nb, L, Dh)

        qh, kh, vh = to_heads(q), to_heads(k), to_heads(v)

        # ---- all heads + all batches: ONE batched dot / softmax / dot ----
        s = jnp.einsum("gld,gmd->glm", qh, kh,
                       preferred_element_type=jnp.float32)      # (H*nb, L, L)
        s = s - jnp.max(s, axis=-1, keepdims=True)
        p = jnp.exp(s)
        p = p * pl.reciprocal(jnp.sum(p, axis=-1, keepdims=True), approx=True)
        o = jnp.einsum("glm,gmd->gld", p, vh,
                       preferred_element_type=jnp.float32)      # (H*nb, L, Dh)

        # ---- concat heads back onto lanes: (rows, E) ----
        o = o.reshape(H, nb * L, Dh)
        attn = jnp.concatenate([o[h] for h in range(H)], axis=-1)

        # ---- output projection + residual ----
        attn_out = jnp.dot(attn.astype(jnp.bfloat16), wo_ref[...],
                           preferred_element_type=jnp.float32) + bo_ref[...]
        Hm = attn_out + x                                 # H = attn + Y

        # ---- rff (Linear) + residual + LayerNorm (f32 epilogue) ----
        H_out = jnp.dot(Hm.astype(jnp.bfloat16), wr_ref[...],
                        preferred_element_type=jnp.float32) + br_ref[...]
        y = H_out + Hm
        mean = jnp.mean(y, axis=-1, keepdims=True)
        var = jnp.mean((y - mean) ** 2, axis=-1, keepdims=True)
        o_ref[...] = (y - mean) * lax.rsqrt(var + LN_EPS) * g_ref[...] + beta_ref[...]

    return kernel


def sab_forward(x_lne, params, *, rows_target=None, vmem_limit_bytes=None):
    L, N, E = x_lne.shape
    H = NUM_HEADS
    assert E % H == 0, "embed_dim must be divisible by num_heads"
    Dh = E // H
    scale = 1.0 / math.sqrt(Dh)

    auto_vmem, auto_rows = _device_budget()
    if rows_target is None:
        rows_target = auto_rows
    if vmem_limit_bytes is None:
        vmem_limit_bytes = auto_vmem

    # Fold batch into the matmul M dimension: nb batches per grid step.
    nb = max(1, min(N, rows_target // max(L, 1)))
    if N >= 2:
        nb = min(nb, -(-N // 2))          # >= 2 grid tiles -> both v7x cores
    unit = 8 // math.gcd(L, 8)            # keep nb*L a multiple of 8
    nb = max(unit, (nb // unit) * unit)
    n_tiles = -(-N // nb)                  # cdiv
    Npad = n_tiles * nb
    rows = nb * L

    x = jnp.transpose(x_lne, (1, 0, 2))    # (N, L, E) batch-major
    if Npad != N:
        x = jnp.pad(x, ((0, Npad - N), (0, 0), (0, 0)))
    x2d = x.reshape(Npad * L, E)           # (Npad*L, E)

    # Pre-split / pre-transpose / pre-scale weights (wrapper-side, plain XLA).
    w_in = params["in_proj_weight"]        # (3E, E), rows [Wq; Wk; Wv]
    b_in = params["in_proj_bias"]          # (3E,)
    wq_t = (w_in[:E] * scale).T            # scale folded into Wq
    wk_t = w_in[E:2 * E].T
    wv_t = w_in[2 * E:].T
    wqkv_t = jnp.concatenate([wq_t, wk_t, wv_t], axis=1).astype(jnp.bfloat16)  # (E,3E)
    bqkv = jnp.concatenate([b_in[:E] * scale, b_in[E:2 * E], b_in[2 * E:]]).reshape(1, 3 * E)
    wo_t = params["out_proj_weight"].T.astype(jnp.bfloat16)
    bo = params["out_proj_bias"].reshape(1, E)
    wr_t = params["rff_weight"].T.astype(jnp.bfloat16)
    br = params["rff_bias"].reshape(1, E)
    g = params["ln_gamma"].reshape(1, E)
    b = params["ln_beta"].reshape(1, E)

    def full(shape):
        # whole-array block, constant index map
        return pl.BlockSpec(shape, lambda i: (0,) * len(shape))

    kernel = make_sab_kernel(nb, L, E, H)

    rows_total = Npad * L
    cost = pl.CostEstimate(
        flops=int(rows_total * (2 * E * 3 * E + 4 * E * E)
                  + Npad * H * 4 * L * L * Dh),
        transcendentals=int(Npad * H * L * L + 2 * rows_total),
        bytes_accessed=int(8 * rows_total * E + 2 * 5 * E * E + 4 * 9 * E),
    )

    out2d = pl.pallas_call(
        kernel,
        out_shape=jax.ShapeDtypeStruct((rows_total, E), jnp.float32),
        grid=(n_tiles,),
        in_specs=[
            pl.BlockSpec((rows, E), lambda i: (i, 0)),    # X rows (batch-folded)
            full((E, 3 * E)), full((1, 3 * E)),           # fused Wqkv^T (bf16), bqkv
            full((E, E)), full((1, E)),                   # Wo^T, bo
            full((E, E)), full((1, E)),                   # Wrff^T, brff
            full((1, E)), full((1, E)),                   # ln gamma, ln beta
        ],
        out_specs=pl.BlockSpec((rows, E), lambda i: (i, 0)),
        compiler_params=pltpu.CompilerParams(
            dimension_semantics=("parallel",),
            vmem_limit_bytes=int(vmem_limit_bytes),
        ),
        cost_estimate=cost,
    )(x2d, wqkv_t, bqkv, wo_t, bo, wr_t, br, g, b)

    out = out2d.reshape(Npad, L, E)[:N]
    return jnp.transpose(out, (1, 0, 2))                  # back to (L, N, E)


def sab_reference(x_lne, params):
    """Pure-JAX f32 reference mirroring torch's MAB forward (validation)."""
    L, N, E = x_lne.shape
    H, Dh = NUM_HEADS, E // NUM_HEADS
    x = x_lne
    qkv = jnp.einsum("lne,fe->lnf", x, params["in_proj_weight"]) + params["in_proj_bias"]
    q, k, v = qkv[..., :E], qkv[..., E:2 * E], qkv[..., 2 * E:]

    def split(t):
        return t.reshape(L, N, H, Dh).transpose(1, 2, 0, 3)  # (N, H, L, Dh)

    qh, kh, vh = split(q), split(k), split(v)
    s = jnp.einsum("nhld,nhmd->nhlm", qh / math.sqrt(Dh), kh)
    p = jax.nn.softmax(s, axis=-1)
    o = jnp.einsum("nhlm,nhmd->nhld", p, vh)
    o = o.transpose(2, 0, 1, 3).reshape(L, N, E)
    attn_out = jnp.einsum("lne,fe->lnf", o, params["out_proj_weight"]) + params["out_proj_bias"]
    Hm = attn_out + x
    Ho = jnp.einsum("lne,fe->lnf", Hm, params["rff_weight"]) + params["rff_bias"]
    y = Ho + Hm
    mean = jnp.mean(y, -1, keepdims=True)
    var = jnp.mean((y - mean) ** 2, -1, keepdims=True)
    return (y - mean) / jnp.sqrt(var + LN_EPS) * params["ln_gamma"] + params["ln_beta"]


def make_params(key, E):
    ks = jax.random.split(key, 6)
    scale = 0.05
    return {
        "in_proj_weight": scale * jax.random.normal(ks[0], (3 * E, E), jnp.float32),
        "in_proj_bias": scale * jax.random.normal(ks[1], (3 * E,), jnp.float32),
        "out_proj_weight": scale * jax.random.normal(ks[2], (E, E), jnp.float32),
        "out_proj_bias": jnp.zeros((E,), jnp.float32),
        "rff_weight": scale * jax.random.normal(ks[3], (E, E), jnp.float32),
        "rff_bias": scale * jax.random.normal(ks[4], (E,), jnp.float32),
        "ln_gamma": jnp.ones((E,), jnp.float32),
        "ln_beta": jnp.zeros((E,), jnp.float32),
    }


if __name__ == "__main__":
    L, N, E = 8, 2, 32   # seq=8, batch=2, embed_dim=32 (8 heads -> head_dim=4)
    key = jax.random.PRNGKey(0)
    k_x, k_p = jax.random.split(key)
    X = jax.random.normal(k_x, (L, N, E), jnp.float32)   # (seq, batch, embed)
    params = make_params(k_p, E)

    out = sab_forward(X, params)
    out = jax.block_until_ready(out)

    ref = sab_reference(X, params)
    assert out.shape == (L, N, E)
    # bf16 matmul operands + approx reciprocal -> looser tolerance than pure f32
    assert jnp.allclose(out, ref, atol=2e-2, rtol=2e-2), "mismatch vs JAX reference"
    print("KERNEL_OK")
</pallas_src>

<mosaic_0001>
module attributes {stable_mosaic.version = 11 : i64} {
  func.func @kernel(%arg0: i32, %arg1: memref<8x32xf32, #tpu.memory_space<vmem>>, %arg2: memref<32x96xbf16, #tpu.memory_space<vmem>>, %arg3: memref<1x96xf32, #tpu.memory_space<vmem>>, %arg4: memref<32x32xbf16, #tpu.memory_space<vmem>>, %arg5: memref<1x32xf32, #tpu.memory_space<vmem>>, %arg6: memref<32x32xbf16, #tpu.memory_space<vmem>>, %arg7: memref<1x32xf32, #tpu.memory_space<vmem>>, %arg8: memref<1x32xf32, #tpu.memory_space<vmem>>, %arg9: memref<1x32xf32, #tpu.memory_space<vmem>>, %arg10: memref<8x32xf32, #tpu.memory_space<vmem>>) attributes {dimension_semantics = [#tpu.dimension_semantics<parallel>], iteration_bounds = array<i64: 2>, scalar_prefetch = 0 : i64, scratch_operands = 0 : i64, tpu.core_type = #tpu.core_type<tc>, window_params = [{transform_indices = @transform_0, window_bounds = array<i64: 8, 32>}, {pipeline_mode = #tpu.pipeline_mode<synchronous>, transform_indices = @transform_1, window_bounds = array<i64: 32, 96>}, {pipeline_mode = #tpu.pipeline_mode<synchronous>, transform_indices = @transform_2, window_bounds = array<i64: 1, 96>}, {pipeline_mode = #tpu.pipeline_mode<synchronous>, transform_indices = @transform_3, window_bounds = array<i64: 32, 32>}, {pipeline_mode = #tpu.pipeline_mode<synchronous>, transform_indices = @transform_4, window_bounds = array<i64: 1, 32>}, {pipeline_mode = #tpu.pipeline_mode<synchronous>, transform_indices = @transform_5, window_bounds = array<i64: 32, 32>}, {pipeline_mode = #tpu.pipeline_mode<synchronous>, transform_indices = @transform_6, window_bounds = array<i64: 1, 32>}, {pipeline_mode = #tpu.pipeline_mode<synchronous>, transform_indices = @transform_7, window_bounds = array<i64: 1, 32>}, {pipeline_mode = #tpu.pipeline_mode<synchronous>, transform_indices = @transform_8, window_bounds = array<i64: 1, 32>}, {transform_indices = @transform_9, window_bounds = array<i64: 8, 32>}]} {
    %c0 = arith.constant 0 : index
    %c0_0 = arith.constant 0 : index
    %0 = vector.load %arg1[%c0, %c0_0] : memref<8x32xf32, #tpu.memory_space<vmem>>, vector<8x32xf32>
    %1 = arith.truncf %0 : vector<8x32xf32> to vector<8x32xbf16>
    %c0_1 = arith.constant 0 : index
    %c0_2 = arith.constant 0 : index
    %2 = vector.load %arg2[%c0_1, %c0_2] : memref<32x96xbf16, #tpu.memory_space<vmem>>, vector<32x96xbf16>
    %cst = arith.constant dense<0.000000e+00> : vector<8x96xf32>
    %3 = tpu.matmul %1, %2, %cst {dimension_numbers = #tpu.dot_dimension_numbers<[1], [0], [0], [1], [0, 0, 1, 1], [], []>} : vector<8x32xbf16>, vector<32x96xbf16>, vector<8x96xf32> -> vector<8x96xf32>
    %c0_3 = arith.constant 0 : index
    %c0_4 = arith.constant 0 : index
    %4 = vector.load %arg3[%c0_3, %c0_4] : memref<1x96xf32, #tpu.memory_space<vmem>>, vector<1x96xf32>
    %5 = vector.broadcast %4 : vector<1x96xf32> to vector<8x96xf32>
    %6 = arith.addf %3, %5 : vector<8x96xf32>
    %7 = vector.extract_strided_slice %6 {offsets = [0, 0], sizes = [8, 32], strides = [1, 1]} : vector<8x96xf32> to vector<8x32xf32>
    %8 = vector.shape_cast %7 : vector<8x32xf32> to vector<1x8x32xf32>
    %9 = vector.extract_strided_slice %6 {offsets = [0, 32], sizes = [8, 32], strides = [1, 1]} : vector<8x96xf32> to vector<8x32xf32>
    %10 = vector.shape_cast %9 : vector<8x32xf32> to vector<1x8x32xf32>
    %11 = vector.extract_strided_slice %6 {offsets = [0, 64], sizes = [8, 32], strides = [1, 1]} : vector<8x96xf32> to vector<8x32xf32>
    %12 = vector.shape_cast %11 : vector<8x32xf32> to vector<1x8x32xf32>
    %13 = vector.extract_strided_slice %8 {offsets = [0, 0, 0], sizes = [1, 8, 4], strides = [1, 1, 1]} : vector<1x8x32xf32> to vector<1x8x4xf32>
    %14 = vector.extract_strided_slice %8 {offsets = [0, 0, 4], sizes = [1, 8, 4], strides = [1, 1, 1]} : vector<1x8x32xf32> to vector<1x8x4xf32>
    %15 = vector.extract_strided_slice %8 {offsets = [0, 0, 8], sizes = [1, 8, 4], strides = [1, 1, 1]} : vector<1x8x32xf32> to vector<1x8x4xf32>
    %16 = vector.extract_strided_slice %8 {offsets = [0, 0, 12], sizes = [1, 8, 4], strides = [1, 1, 1]} : vector<1x8x32xf32> to vector<1x8x4xf32>
    %17 = vector.extract_strided_slice %8 {offsets = [0, 0, 16], sizes = [1, 8, 4], strides = [1, 1, 1]} : vector<1x8x32xf32> to vector<1x8x4xf32>
    %18 = vector.extract_strided_slice %8 {offsets = [0, 0, 20], sizes = [1, 8, 4], strides = [1, 1, 1]} : vector<1x8x32xf32> to vector<1x8x4xf32>
    %19 = vector.extract_strided_slice %8 {offsets = [0, 0, 24], sizes = [1, 8, 4], strides = [1, 1, 1]} : vector<1x8x32xf32> to vector<1x8x4xf32>
    %20 = vector.extract_strided_slice %8 {offsets = [0, 0, 28], sizes = [1, 8, 4], strides = [1, 1, 1]} : vector<1x8x32xf32> to vector<1x8x4xf32>
    %21 = vector.shape_cast %13 : vector<1x8x4xf32> to vector<1x1x8x4xf32>
    %22 = vector.shape_cast %14 : vector<1x8x4xf32> to vector<1x1x8x4xf32>
    %23 = vector.shape_cast %15 : vector<1x8x4xf32> to vector<1x1x8x4xf32>
    %24 = vector.shape_cast %16 : vector<1x8x4xf32> to vector<1x1x8x4xf32>
    %25 = vector.shape_cast %17 : vector<1x8x4xf32> to vector<1x1x8x4xf32>
    %26 = vector.shape_cast %18 : vector<1x8x4xf32> to vector<1x1x8x4xf32>
    %27 = vector.shape_cast %19 : vector<1x8x4xf32> to vector<1x1x8x4xf32>
    %28 = vector.shape_cast %20 : vector<1x8x4xf32> to vector<1x1x8x4xf32>
    %29 = tpu.concatenate %21, %22, %23, %24, %25, %26, %27, %28 in 0 : vector<1x1x8x4xf32>, vector<1x1x8x4xf32>, vector<1x1x8x4xf32>, vector<1x1x8x4xf32>, vector<1x1x8x4xf32>, vector<1x1x8x4xf32>, vector<1x1x8x4xf32>, vector<1x1x8x4xf32> -> vector<8x1x8x4xf32>
    %30 = vector.shape_cast %29 : vector<8x1x8x4xf32> to vector<8x8x4xf32>
    %31 = vector.extract_strided_slice %10 {offsets = [0, 0, 0], sizes = [1, 8, 4], strides = [1, 1, 1]} : vector<1x8x32xf32> to vector<1x8x4xf32>
    %32 = vector.extract_strided_slice %10 {offsets = [0, 0, 4], sizes = [1, 8, 4], strides = [1, 1, 1]} : vector<1x8x32xf32> to vector<1x8x4xf32>
    %33 = vector.extract_strided_slice %10 {offsets = [0, 0, 8], sizes = [1, 8, 4], strides = [1, 1, 1]} : vector<1x8x32xf32> to vector<1x8x4xf32>
    %34 = vector.extract_strided_slice %10 {offsets = [0, 0, 12], sizes = [1, 8, 4], strides = [1, 1, 1]} : vector<1x8x32xf32> to vector<1x8x4xf32>
    %35 = vector.extract_strided_slice %10 {offsets = [0, 0, 16], sizes = [1, 8, 4], strides = [1, 1, 1]} : vector<1x8x32xf32> to vector<1x8x4xf32>
    %36 = vector.extract_strided_slice %10 {offsets = [0, 0, 20], sizes = [1, 8, 4], strides = [1, 1, 1]} : vector<1x8x32xf32> to vector<1x8x4xf32>
    %37 = vector.extract_strided_slice %10 {offsets = [0, 0, 24], sizes = [1, 8, 4], strides = [1, 1, 1]} : vector<1x8x32xf32> to vector<1x8x4xf32>
    %38 = vector.extract_strided_slice %10 {offsets = [0, 0, 28], sizes = [1, 8, 4], strides = [1, 1, 1]} : vector<1x8x32xf32> to vector<1x8x4xf32>
    %39 = vector.shape_cast %31 : vector<1x8x4xf32> to vector<1x1x8x4xf32>
    %40 = vector.shape_cast %32 : vector<1x8x4xf32> to vector<1x1x8x4xf32>
    %41 = vector.shape_cast %33 : vector<1x8x4xf32> to vector<1x1x8x4xf32>
    %42 = vector.shape_cast %34 : vector<1x8x4xf32> to vector<1x1x8x4xf32>
    %43 = vector.shape_cast %35 : vector<1x8x4xf32> to vector<1x1x8x4xf32>
    %44 = vector.shape_cast %36 : vector<1x8x4xf32> to vector<1x1x8x4xf32>
    %45 = vector.shape_cast %37 : vector<1x8x4xf32> to vector<1x1x8x4xf32>
    %46 = vector.shape_cast %38 : vector<1x8x4xf32> to vector<1x1x8x4xf32>
    %47 = tpu.concatenate %39, %40, %41, %42, %43, %44, %45, %46 in 0 : vector<1x1x8x4xf32>, vector<1x1x8x4xf32>, vector<1x1x8x4xf32>, vector<1x1x8x4xf32>, vector<1x1x8x4xf32>, vector<1x1x8x4xf32>, vector<1x1x8x4xf32>, vector<1x1x8x4xf32> -> vector<8x1x8x4xf32>
    %48 = vector.shape_cast %47 : vector<8x1x8x4xf32> to vector<8x8x4xf32>
    %49 = vector.extract_strided_slice %12 {offsets = [0, 0, 0], sizes = [1, 8, 4], strides = [1, 1, 1]} : vector<1x8x32xf32> to vector<1x8x4xf32>
    %50 = vector.extract_strided_slice %12 {offsets = [0, 0, 4], sizes = [1, 8, 4], strides = [1, 1, 1]} : vector<1x8x32xf32> to vector<1x8x4xf32>
    %51 = vector.extract_strided_slice %12 {offsets = [0, 0, 8], sizes = [1, 8, 4], strides = [1, 1, 1]} : vector<1x8x32xf32> to vector<1x8x4xf32>
    %52 = vector.extract_strided_slice %12 {offsets = [0, 0, 12], sizes = [1, 8, 4], strides = [1, 1, 1]} : vector<1x8x32xf32> to vector<1x8x4xf32>
    %53 = vector.extract_strided_slice %12 {offsets = [0, 0, 16], sizes = [1, 8, 4], strides = [1, 1, 1]} : vector<1x8x32xf32> to vector<1x8x4xf32>
    %54 = vector.extract_strided_slice %12 {offsets = [0, 0, 20], sizes = [1, 8, 4], strides = [1, 1, 1]} : vector<1x8x32xf32> to vector<1x8x4xf32>
    %55 = vector.extract_strided_slice %12 {offsets = [0, 0, 24], sizes = [1, 8, 4], strides = [1, 1, 1]} : vector<1x8x32xf32> to vector<1x8x4xf32>
    %56 = vector.extract_strided_slice %12 {offsets = [0, 0, 28], sizes = [1, 8, 4], strides = [1, 1, 1]} : vector<1x8x32xf32> to vector<1x8x4xf32>
    %57 = vector.shape_cast %49 : vector<1x8x4xf32> to vector<1x1x8x4xf32>
    %58 = vector.shape_cast %50 : vector<1x8x4xf32> to vector<1x1x8x4xf32>
    %59 = vector.shape_cast %51 : vector<1x8x4xf32> to vector<1x1x8x4xf32>
    %60 = vector.shape_cast %52 : vector<1x8x4xf32> to vector<1x1x8x4xf32>
    %61 = vector.shape_cast %53 : vector<1x8x4xf32> to vector<1x1x8x4xf32>
    %62 = vector.shape_cast %54 : vector<1x8x4xf32> to vector<1x1x8x4xf32>
    %63 = vector.shape_cast %55 : vector<1x8x4xf32> to vector<1x1x8x4xf32>
    %64 = vector.shape_cast %56 : vector<1x8x4xf32> to vector<1x1x8x4xf32>
    %65 = tpu.concatenate %57, %58, %59, %60, %61, %62, %63, %64 in 0 : vector<1x1x8x4xf32>, vector<1x1x8x4xf32>, vector<1x1x8x4xf32>, vector<1x1x8x4xf32>, vector<1x1x8x4xf32>, vector<1x1x8x4xf32>, vector<1x1x8x4xf32>, vector<1x1x8x4xf32> -> vector<8x1x8x4xf32>
    %66 = vector.shape_cast %65 : vector<8x1x8x4xf32> to vector<8x8x4xf32>
    "tpu.trace_start"() <{level = 10 : i32, message = "gld,gmd->glm"}> : () -> ()
    %cst_5 = arith.constant dense<0.000000e+00> : vector<8x8x8xf32>
    %67 = tpu.matmul %30, %48, %cst_5 {dimension_numbers = #tpu.dot_dimension_numbers<[2], [2], [1], [1], [0, 0, 0, 1, 1, 1], [0], [0]>} : vector<8x8x4xf32>, vector<8x8x4xf32>, vector<8x8x8xf32> -> vector<8x8x8xf32>
    "tpu.trace_stop"() : () -> ()
    %cst_6 = arith.constant dense<0xFF800000> : vector<8x8xf32>
    %68 = vector.multi_reduction <maximumf>, %67, %cst_6 [2] : vector<8x8x8xf32> to vector<8x8xf32>
    %69 = vector.shape_cast %68 : vector<8x8xf32> to vector<8x8x1xf32>
    %70 = vector.broadcast %69 : vector<8x8x1xf32> to vector<8x8x8xf32>
    %71 = arith.subf %67, %70 : vector<8x8x8xf32>
    %72 = math.exp %71 : vector<8x8x8xf32>
    %cst_7 = arith.constant dense<0.000000e+00> : vector<8x8xf32>
    %73 = vector.multi_reduction <add>, %72, %cst_7 [2] : vector<8x8x8xf32> to vector<8x8xf32>
    %74 = vector.shape_cast %73 : vector<8x8xf32> to vector<8x8x1xf32>
    %75 = tpu.reciprocal %74 {approx = true} : vector<8x8x1xf32> -> vector<8x8x1xf32>
    %76 = vector.broadcast %75 : vector<8x8x1xf32> to vector<8x8x8xf32>
    %77 = arith.mulf %72, %76 : vector<8x8x8xf32>
    "tpu.trace_start"() <{level = 10 : i32, message = "glm,gmd->gld"}> : () -> ()
    %cst_8 = arith.constant dense<0.000000e+00> : vector<8x8x4xf32>
    %78 = tpu.matmul %77, %66, %cst_8 {dimension_numbers = #tpu.dot_dimension_numbers<[2], [1], [1], [2], [0, 0, 0, 1, 1, 2], [0], [0]>} : vector<8x8x8xf32>, vector<8x8x4xf32>, vector<8x8x4xf32> -> vector<8x8x4xf32>
    "tpu.trace_stop"() : () -> ()
    %79 = vector.extract_strided_slice %78 {offsets = [0, 0, 0], sizes = [1, 8, 4], strides = [1, 1, 1]} : vector<8x8x4xf32> to vector<1x8x4xf32>
    %80 = vector.shape_cast %79 : vector<1x8x4xf32> to vector<8x4xf32>
    %81 = vector.extract_strided_slice %78 {offsets = [1, 0, 0], sizes = [1, 8, 4], strides = [1, 1, 1]} : vector<8x8x4xf32> to vector<1x8x4xf32>
    %82 = vector.shape_cast %81 : vector<1x8x4xf32> to vector<8x4xf32>
    %83 = vector.extract_strided_slice %78 {offsets = [2, 0, 0], sizes = [1, 8, 4], strides = [1, 1, 1]} : vector<8x8x4xf32> to vector<1x8x4xf32>
    %84 = vector.shape_cast %83 : vector<1x8x4xf32> to vector<8x4xf32>
    %85 = vector.extract_strided_slice %78 {offsets = [3, 0, 0], sizes = [1, 8, 4], strides = [1, 1, 1]} : vector<8x8x4xf32> to vector<1x8x4xf32>
    %86 = vector.shape_cast %85 : vector<1x8x4xf32> to vector<8x4xf32>
    %87 = vector.extract_strided_slice %78 {offsets = [4, 0, 0], sizes = [1, 8, 4], strides = [1, 1, 1]} : vector<8x8x4xf32> to vector<1x8x4xf32>
    %88 = vector.shape_cast %87 : vector<1x8x4xf32> to vector<8x4xf32>
    %89 = vector.extract_strided_slice %78 {offsets = [5, 0, 0], sizes = [1, 8, 4], strides = [1, 1, 1]} : vector<8x8x4xf32> to vector<1x8x4xf32>
    %90 = vector.shape_cast %89 : vector<1x8x4xf32> to vector<8x4xf32>
    %91 = vector.extract_strided_slice %78 {offsets = [6, 0, 0], sizes = [1, 8, 4], strides = [1, 1, 1]} : vector<8x8x4xf32> to vector<1x8x4xf32>
    %92 = vector.shape_cast %91 : vector<1x8x4xf32> to vector<8x4xf32>
    %93 = vector.extract_strided_slice %78 {offsets = [7, 0, 0], sizes = [1, 8, 4], strides = [1, 1, 1]} : vector<8x8x4xf32> to vector<1x8x4xf32>
    %94 = vector.shape_cast %93 : vector<1x8x4xf32> to vector<8x4xf32>
    %95 = tpu.concatenate %80, %82, %84, %86, %88, %90, %92, %94 in 1 : vector<8x4xf32>, vector<8x4xf32>, vector<8x4xf32>, vector<8x4xf32>, vector<8x4xf32>, vector<8x4xf32>, vector<8x4xf32>, vector<8x4xf32> -> vector<8x32xf32>
    %96 = arith.truncf %95 : vector<8x32xf32> to vector<8x32xbf16>
    %c0_9 = arith.constant 0 : index
    %c0_10 = arith.constant 0 : index
    %97 = vector.load %arg4[%c0_9, %c0_10] : memref<32x32xbf16, #tpu.memory_space<vmem>>, vector<32x32xbf16>
    %cst_11 = arith.constant dense<0.000000e+00> : vector<8x32xf32>
    %98 = tpu.matmul %96, %97, %cst_11 {dimension_numbers = #tpu.dot_dimension_numbers<[1], [0], [0], [1], [0, 0, 1, 1], [], []>} : vector<8x32xbf16>, vector<32x32xbf16>, vector<8x32xf32> -> vector<8x32xf32>
    %c0_12 = arith.constant 0 : index
    %c0_13 = arith.constant 0 : index
    %99 = vector.load %arg5[%c0_12, %c0_13] : memref<1x32xf32, #tpu.memory_space<vmem>>, vector<1x32xf32>
    %100 = vector.broadcast %99 : vector<1x32xf32> to vector<8x32xf32>
    %101 = arith.addf %98, %100 : vector<8x32xf32>
    %102 = arith.addf %101, %0 : vector<8x32xf32>
    %103 = arith.truncf %102 : vector<8x32xf32> to vector<8x32xbf16>
    %c0_14 = arith.constant 0 : index
    %c0_15 = arith.constant 0 : index
    %104 = vector.load %arg6[%c0_14, %c0_15] : memref<32x32xbf16, #tpu.memory_space<vmem>>, vector<32x32xbf16>
    %cst_16 = arith.constant dense<0.000000e+00> : vector<8x32xf32>
    %105 = tpu.matmul %103, %104, %cst_16 {dimension_numbers = #tpu.dot_dimension_numbers<[1], [0], [0], [1], [0, 0, 1, 1], [], []>} : vector<8x32xbf16>, vector<32x32xbf16>, vector<8x32xf32> -> vector<8x32xf32>
    %c0_17 = arith.constant 0 : index
    %c0_18 = arith.constant 0 : index
    %106 = vector.load %arg7[%c0_17, %c0_18] : memref<1x32xf32, #tpu.memory_space<vmem>>, vector<1x32xf32>
    %107 = vector.broadcast %106 : vector<1x32xf32> to vector<8x32xf32>
    %108 = arith.addf %105, %107 : vector<8x32xf32>
    %109 = arith.addf %108, %102 : vector<8x32xf32>
    %cst_19 = arith.constant dense<0.000000e+00> : vector<8xf32>
    %110 = vector.multi_reduction <add>, %109, %cst_19 [1] : vector<8x32xf32> to vector<8xf32>
    %111 = vector.shape_cast %110 : vector<8xf32> to vector<8x1xf32>
    %cst_20 = arith.constant 3.200000e+01 : f32
    %112 = vector.broadcast %cst_20 : f32 to vector<8x1xf32>
    %113 = arith.divf %111, %112 : vector<8x1xf32>
    %114 = vector.broadcast %113 : vector<8x1xf32> to vector<8x32xf32>
    %115 = arith.subf %109, %114 : vector<8x32xf32>
    %116 = arith.mulf %115, %115 : vector<8x32xf32>
    %cst_21 = arith.constant dense<0.000000e+00> : vector<8xf32>
    %117 = vector.multi_reduction <add>, %116, %cst_21 [1] : vector<8x32xf32> to vector<8xf32>
    %118 = vector.shape_cast %117 : vector<8xf32> to vector<8x1xf32>
    %cst_22 = arith.constant 3.200000e+01 : f32
    %119 = vector.broadcast %cst_22 : f32 to vector<8x1xf32>
    %120 = arith.divf %118, %119 : vector<8x1xf32>
    %121 = vector.broadcast %113 : vector<8x1xf32> to vector<8x32xf32>
    %122 = arith.subf %109, %121 : vector<8x32xf32>
    %cst_23 = arith.constant 9.99999974E-6 : f32
    %123 = vector.broadcast %cst_23 : f32 to vector<8x1xf32>
    %124 = arith.addf %120, %123 : vector<8x1xf32>
    %125 = math.rsqrt %124 : vector<8x1xf32>
    %126 = vector.broadcast %125 : vector<8x1xf32> to vector<8x32xf32>
    %127 = arith.mulf %122, %126 : vector<8x32xf32>
    %c0_24 = arith.constant 0 : index
    %c0_25 = arith.constant 0 : index
    %128 = vector.load %arg8[%c0_24, %c0_25] : memref<1x32xf32, #tpu.memory_space<vmem>>, vector<1x32xf32>
    %129 = vector.broadcast %128 : vector<1x32xf32> to vector<8x32xf32>
    %130 = arith.mulf %127, %129 : vector<8x32xf32>
    %c0_26 = arith.constant 0 : index
    %c0_27 = arith.constant 0 : index
    %131 = vector.load %arg9[%c0_26, %c0_27] : memref<1x32xf32, #tpu.memory_space<vmem>>, vector<1x32xf32>
    %132 = vector.broadcast %131 : vector<1x32xf32> to vector<8x32xf32>
    %133 = arith.addf %130, %132 : vector<8x32xf32>
    %c0_28 = arith.constant 0 : index
    %c0_29 = arith.constant 0 : index
    %134 = vector.load %arg10[%c0_28, %c0_29] : memref<8x32xf32, #tpu.memory_space<vmem>>, vector<8x32xf32>
    tpu.vector_store %arg10[%c0_28, %c0_29], %133 {strides = array<i32>} : memref<8x32xf32, #tpu.memory_space<vmem>>, vector<8x32xf32>,
    return
  }
  func.func @transform_0(%arg0: i32) -> (i32, i32) {
    %c0_i32 = arith.constant 0 : i32
    %c0_i32_0 = arith.constant 0 : i32
    return %arg0, %c0_i32 : i32, i32
  }
  func.func @transform_1(%arg0: i32) -> (i32, i32) {
    %c0_i32 = arith.constant 0 : i32
    %c0_i32_0 = arith.constant 0 : i32
    %c0_i32_1 = arith.constant 0 : i32
    return %c0_i32, %c0_i32_0 : i32, i32
  }
  func.func @transform_2(%arg0: i32) -> (i32, i32) {
    %c0_i32 = arith.constant 0 : i32
    %c0_i32_0 = arith.constant 0 : i32
    %c0_i32_1 = arith.constant 0 : i32
    return %c0_i32, %c0_i32_0 : i32, i32
  }
  func.func @transform_3(%arg0: i32) -> (i32, i32) {
    %c0_i32 = arith.constant 0 : i32
    %c0_i32_0 = arith.constant 0 : i32
    %c0_i32_1 = arith.constant 0 : i32
    return %c0_i32, %c0_i32_0 : i32, i32
  }
  func.func @transform_4(%arg0: i32) -> (i32, i32) {
    %c0_i32 = arith.constant 0 : i32
    %c0_i32_0 = arith.constant 0 : i32
    %c0_i32_1 = arith.constant 0 : i32
    return %c0_i32, %c0_i32_0 : i32, i32
  }
  func.func @transform_5(%arg0: i32) -> (i32, i32) {
    %c0_i32 = arith.constant 0 : i32
    %c0_i32_0 = arith.constant 0 : i32
    %c0_i32_1 = arith.constant 0 : i32
    return %c0_i32, %c0_i32_0 : i32, i32
  }
  func.func @transform_6(%arg0: i32) -> (i32, i32) {
    %c0_i32 = arith.constant 0 : i32
    %c0_i32_0 = arith.constant 0 : i32
    %c0_i32_1 = arith.constant 0 : i32
    return %c0_i32, %c0_i32_0 : i32, i32
  }
  func.func @transform_7(%arg0: i32) -> (i32, i32) {
    %c0_i32 = arith.constant 0 : i32
    %c0_i32_0 = arith.constant 0 : i32
    %c0_i32_1 = arith.constant 0 : i32
    return %c0_i32, %c0_i32_0 : i32, i32
  }
  func.func @transform_8(%arg0: i32) -> (i32, i32) {
    %c0_i32 = arith.constant 0 : i32
    %c0_i32_0 = arith.constant 0 : i32
    %c0_i32_1 = arith.constant 0 : i32
    return %c0_i32, %c0_i32_0 : i32, i32
  }
  func.func @transform_9(%arg0: i32) -> (i32, i32) {
    %c0_i32 = arith.constant 0 : i32
    %c0_i32_0 = arith.constant 0 : i32
    return %arg0, %c0_i32 : i32, i32
  }
}

</mosaic_0001>

<bundles_post_ra>
// kernel: tpu_custom_call.1
= control target key start
LH: loop header
LB: loop body
LE: loop exit
PB: predicated region body
PF: predicated region fallthrough
CT: control target
= control target key end

     0   :  { %14 = vsyncpa [#allocation3], 0  ;;  %s3070_s0 = inlined_call_operand.hbm [shape: f32[16,32], index: 0, kind: input, shape index: {}]   ;;  %s3071_s1 = inlined_call_operand.hbm [shape: bf16[32,96], index: 1, kind: input, shape index: {}]   ;;  %s3072_s2 = inlined_call_operand.vmem [shape: f32[1,96], index: 2, kind: input, shape index: {}]   ;;  %s3073_s3 = inlined_call_operand.hbm [shape: bf16[32,32], index: 3, kind: input, shape index: {}]   ;;  %s3074_s4 = inlined_call_operand.vmem [shape: f32[1,32], index: 4, kind: input, shape index: {}]   ;;  %s3075_s5 = inlined_call_operand.vmem [shape: bf16[32,32], index: 5, kind: input, shape index: {}]   ;;  %s3076_s6 = inlined_call_operand.vmem [shape: f32[1,32], index: 6, kind: input, shape index: {}]   ;;  %s3077_s7 = inlined_call_operand.vmem [shape: f32[1,32], index: 7, kind: input, shape index: {}]   ;;  %s3078_s8 = inlined_call_operand.vmem [shape: f32[1,32], index: 8, kind: input, shape index: {}]   ;;  %s3079_s9 = inlined_call_operand.hbm [shape: f32[16,32], index: 9, kind: output, shape index: {}]  }
   0x1   :  { %16 = vsyncpa [#allocation3 + $0x1], 0 }
   0x2   :  { %17 = vsyncpa [#allocation6], 0 }
   0x3   :  { %18 = vsyncpa [#allocation4], 0 }
   0x4   :  { %20 = vsyncpa [#allocation4 + $0x1], 0  ;;  %s2636_s30 = smov 0   ;;  %s2638_s10 = smov 0  }
   0x5   :  { %s2640_s11 = smov 0   ;;  %s2642_s12 = smov 0  }
   0x6 LB: > { %s2657_s13 = sadd.s32 4294967295, %s2560_s12   ;;  %s2078_s14 = sadd.s32 4294967294, %s2560_s12   ;;  %s2560_s12 = sphi %s2642_s12, %s3102_s12   ;;  %s2556_s11 = sphi %s2640_s11, %s3101_s11   ;;  %s2552_s10 = sphi %s2638_s10, %s3100_s10   ;;  %s2548_s30 = sphi %s2636_s30, %s3099_s30  }
   0x7   : > { %p46_p0 = scmp.ne.s32.totalorder %s2552_s10, %s2548_s30  ;;  %p3080_p1 = scmp.eq.s32.totalorder %s2657_s13, 0 }
   0x8   : > { %p244_p3 = scmp.eq.s32.totalorder %s2078_s14, 1  ;;  %p2079_p5 = scmp.ge.s32.totalorder %s2560_s12, 1 }
   0x9   : > { %p2666_p4 = por %p3080_p1, %p46_p0  ;;  %p251_p7 = scmp.lt.s32.totalorder %s2560_s12, 3 }
   0xa   : > { %p2671_p6 = por %p244_p3, %p46_p0  ;;  %s2562_s18 = smov [#allocation5]  }
   0xb   : > { %s3084_s15 = scalar_select %p2666_p4, 1, 0 }
   0xc   : > { %s3085_s16 = scalar_select %p2671_p6, 1, 0 }
   0xd   : > { %p2676_p8 = pnand %p2079_p5, %p251_p7  ;;  %s263_s19 = sshll.u32 %s2562_s18, 4  ;;  %s2680_s19 = int_to_ptr.vmem [resolvable:$true] %s263_s19 }
   0xe   : > { %3086 = sst [smem:[#allocation12_spill]] %s3085_s16  ;;  %s2563_s21 = smov [#allocation7]  }
   0xf   : > { %p2289_p9 = pneg %p2676_p8  ;;  %s279_s22 = sshll.u32 %s2563_s21, 4  ;;  %s2691_s22 = int_to_ptr.vmem [resolvable:$true] %s279_s22 }
  0x10   : > { %s2404_s25 = scalar_lea.hbm %s3071_s1, 256 }
  0x11   : > { %p2687_p11 = pnand %p2289_p9, %p3080_p1  ;;  %p2405_p12 = scmp.ne.s32.totalorder %s3071_s1, %s2404_s25 }
  0x12   : > { %p2411_p5 = scmp.lt.u32.totalorder %s2404_s25, %s3071_s1 }
  0x13   : > { %p2406_p13 = pneg %p2687_p11 }
  0x15   : > { %p2407_p0 = pnand %p2406_p13, %p2405_p12 }
  0x17   : > { %p2408_p3 = pneg %p2407_p0 }
  0x19   : > { %p2413_p7 = pnand %p2411_p5, %p2408_p3 }
  0x1b   : > { %2416 = shalt.err (!%p2413_p7)
}
  0x1c   : > { %s2417_s14 = scalar_lea.vmem %s2680_s19, 256  ;;  %p2425_p2 = scmp.lt.s32.totalorder %s2680_s19, %s2680_s19 }
  0x1d   : > { %p2418_p9 = scmp.ne.s32.totalorder %s2680_s19, %s2417_s14  ;;  %p2426_p12 = scmp.lt.s32.totalorder %s2417_s14, %s2417_s14 }
  0x1f   : > { %p2420_p10 = pnand %p2418_p9, %p2406_p13  ;;  %p2427_p0 = por %p2426_p12, %p2425_p2 }
  0x21   : > { %p2421_p1 = pneg %p2420_p10 }
  0x23   : > { %p2428_p6 = pnand %p2427_p0, %p2421_p1 }
  0x25   : > { %2431 = shalt.err (!%p2428_p6)
}
  0x26   : > { %s2564_s18 = smov 64   ;;  %s2565_s21 = smov 4  }
  0x27   : > { %2292 = dma.hbm_to_vmem [thread:$0]  (!%p2687_p11), %s3071_s1, 256, %s2680_s19, [#allocation6], %s2564_s18, %s2564_s18, %s2565_s21  }
  0x28   : > { %s2432_s27 = scalar_lea.hbm %s3073_s3, 256 }
  0x29   : > { %p2433_p2 = scmp.ne.s32.totalorder %s3073_s3, %s2432_s27  ;;  %p2439_p10 = scmp.lt.u32.totalorder %s2432_s27, %s3073_s3 }
  0x2b   : > { %p2435_p1 = pnand %p2433_p2, %p2406_p13 }
  0x2d   : > { %p2436_p6 = pneg %p2435_p1 }
  0x2f   : > { %p2441_p3 = pnand %p2439_p10, %p2436_p6 }
  0x31   : > { %2444 = shalt.err (!%p2441_p3)
}
  0x32   : > { %s2445_s19 = scalar_lea.vmem %s2691_s22, 256  ;;  %p2453_p12 = scmp.lt.s32.totalorder %s2691_s22, %s2691_s22 }
  0x33   : > { %p2446_p5 = scmp.ne.s32.totalorder %s2691_s22, %s2445_s19  ;;  %p2454_p0 = scmp.lt.s32.totalorder %s2445_s19, %s2445_s19 }
  0x35   : > { %p2448_p7 = pnand %p2446_p5, %p2406_p13  ;;  %p2455_p2 = por %p2454_p0, %p2453_p12 }
  0x37   : > { %p2449_p9 = pneg %p2448_p7 }
  0x39   : > { %p2456_p1 = pnand %p2455_p2, %p2449_p9 }
  0x3b   : > { %2459 = shalt.err (!%p2456_p1)
}
  0x3c   : > { %2295 = dma.hbm_to_vmem [thread:$0]  (!%p2687_p11), %s3073_s3, 256, %s2691_s22, [#allocation6], %s2564_s18, %s2564_s18, %s2565_s21  }
  0x3d   : > { %s2746_s24 = sadd.s32 1, %s2560_s12   ;;  %s33_s20 = sadd.s32 1, %s2556_s11 }
  0x3e   : > { %s30_s25 = ssub.s32 %s2560_s12, %s2746_s24  ;;  %p40_p13 = scmp.ne.s32.totalorder %s2556_s11, %s2552_s10 }
  0x3f   : > { %p31_p6 = scmp.eq.s32.totalorder %s30_s25, 0  ;;  %p41_p10 = scmp.eq.s32.totalorder %s2560_s12, 0 }
  0x40   : > { %p3089_p3 = scmp.eq.s32.totalorder %s2657_s13, 1  ;;  %p2306_p7 = scmp.lt.s32.totalorder %s2560_s12, 2 }
  0x41   : > { %s2762_s27 = scalar_select %p31_p6, %s2556_s11, %s33_s20  }
  0x42   : > { %p2756_p5 = por %p3089_p3, %p40_p13  ;;  %p42_p9 = por %p41_p10, %p40_p13 }
  0x43   : > { %s308_s28 = sand.u32 1, %s2556_s11   ;;  %s2084_s22 = sshll.u32 %s2560_s12, 7 }
  0x44   : > { %s3090_s26 = scalar_select %p2756_p5, 1, 0 }
  0x45   : > { %s2083_s29 = sshll.u32 %s308_s28, 3  ;;  %s2769_s14 = scalar_lea.hbm %s3070_s0, %s2084_s22 }
  0x46   : > { %s312_s19 = scalar_lea.vmem [#allocation2], %s2083_s29  ;;  %p2773_p11 = pnand %p2306_p7, %p42_p9 }
  0x47   : > { %s319_s16 = sshll.u32 %s312_s19, 4  ;;  %s309_s20 = scalar_lea.sflag [#allocation3], %s308_s28  ;;  %s2771_s16 = int_to_ptr.vmem [resolvable:$true] %s319_s16 }
  0x48   : > { %s2460_s25 = scalar_lea.hbm %s2769_s14, 128  ;;  %p2462_p0 = pneg %p2773_p11 }
  0x49   : > { %p2461_p12 = scmp.ne.s32.totalorder %s2769_s14, %s2460_s25  ;;  %s2465_s18 = scalar_lea.hbm %s3070_s0, 256 }
  0x4a   : > { %p2466_p13 = scmp.lt.u32.totalorder %s2769_s14, %s3070_s0  ;;  %p2467_p6 = scmp.lt.u32.totalorder %s2465_s18, %s2460_s25 }
  0x4b   : > { %p2463_p2 = pnand %p2462_p0, %p2461_p12  ;;  %p2469_p3 = scmp.lt.u32.totalorder %s2460_s25, %s2769_s14 }
  0x4c   : > { %p2468_p10 = por %p2467_p6, %p2466_p13 }
  0x4d   : > { %p2464_p1 = pneg %p2463_p2 }
  0x4e   : > { %p2470_p7 = por %p2469_p3, %p2468_p10 }
  0x50   : > { %p2471_p9 = pnand %p2470_p7, %p2464_p1 }
  0x52   : > { %2474 = shalt.err (!%p2471_p9)
}
  0x53   : > { %s2475_s28 = scalar_lea.vmem %s2771_s16, 128  ;;  %s2566_s22 = smov [#allocation2]  }
  0x54   : > { %p2476_p12 = scmp.ne.s32.totalorder %s2771_s16, %s2475_s28  ;;  %s2480_s29 = sshll.u32 %s2566_s22, 4  ;;  %s2481_s29 = int_to_ptr.vmem [resolvable:$false] %s2480_s29 }
  0x55   : > { %s2482_s21 = scalar_lea.vmem %s2481_s29, 256  ;;  %p2483_p4 = scmp.lt.s32.totalorder %s2771_s16, %s2481_s29 }
  0x56   : > { %p2478_p2 = pnand %p2476_p12, %p2462_p0  ;;  %p2484_p13 = scmp.lt.s32.totalorder %s2482_s21, %s2475_s28 }
  0x58   : > { %p2479_p5 = pneg %p2478_p2  ;;  %p2485_p6 = por %p2484_p13, %p2483_p4 }
  0x5a   : > { %p2486_p10 = pnand %p2485_p6, %p2479_p5 }
  0x5c   : > { %2489 = shalt.err (!%p2486_p10)
}
  0x5d   : > { %2299 = dma.hbm_to_vmem [thread:$0]  (!%p2773_p11), %s2769_s14, 128, %s2771_s16, %s309_s20  }
  0x5e   : > { %328 = sbr.rel (%p2676_p8) target bundleno = 2192 (0x890), region = 56  ;;  %s2805_s25 = sand.u32 (!%p2676_p8), 1, %s2552_s10  }
  0x5f   : > { %s2086_s18 = sshll.u32 (!%p2676_p8), %s2805_s25, 3  ;;  %s331_s19 = scalar_lea.sflag (!%p2676_p8), [#allocation3], %s2805_s25 }
  0x60   : > { %s334_s28 = scalar_lea.vmem (!%p2676_p8), [#allocation2], %s2086_s18  ;;  %p3092_p4 = scmp.ne.s32.totalorder (!%p2676_p8), %s3084_s15, 0 }
  0x65   : > { %2535 = dma.done.wait (%p3092_p4), %s331_s19, 128  }
  0x66   : > { %2537 = vsyncadd (%p3092_p4), %s331_s19, 4294967168  ;;  %p3093_p5 = scmp.eq.s32.totalorder %s2657_s13, 0 }
  0x68   : > { %2539 = dma.done.wait (%p3093_p5), [#allocation6], 512   ;;  %p3094_p8 = pmov %p3093_p5 }
  0x69   : > { %v2567_v0 = vmov 0.0   ;;  %vm2568_vm0 = vmmov 0   ;;  %v2364_v1 = vld [vmem:[#allocation5] sm:$0xff]   ;;  %v2365_v2 = vld [vmem:[#allocation5 + $0x8] sm:$0xff]   ;;  %v2825_v3 = vld [vmem:[%s334_s28] sm:$0xff]  ;;  %vm403_vm1 = vcmask 261120  }
  0x6a   : > { %2541 = vsyncadd (%p3094_p8), [#allocation6], 4294966784  ;;  %2173 = vmatprep.subr.bf16.mxu0 %v2567_v0  ;;  %2177 = vmatprep.mubr.msk.bf16.mxu0 %vm2568_vm0, %v2567_v0  ;;  %v379_v4 = vpack.c.bf16 %v2825_v3, %v2825_v3  ;;  %v2090_v5 = vld [vmem:[%s3072_s2] ss:$0 sm:$0xff]  ;;  %s2569_s14 = smov 116   ;;  %s2570_s16 = smov 124  }
  0x6b   : > { %2181 = vmatprep.subr.mxu1 %v2567_v0  ;;  %2183 = vmatprep.mubr.msk.f32.mxu1 %vm2568_vm0, %v2567_v0  ;;  %s2571_s23 = smov 112   ;;  %s2572_s20 = smov 120   ;;  %vm464_vm2 = vcmask 31744   ;;  %vm1071_vm3 = vcmask 64512   ;;  %vm1798_vm4 = vcmask 97280   ;;  %vm1800_vm5 = vcmask 130048  }
  0x6c   : > { %2174 = vmatpush3.bf16.msra.mxu0 %v2364_v1  ;;  %s2573_s22 = smov 104   ;;  %s2574_s29 = smov 108   ;;  %vm1802_vm6 = vcmask 162816   ;;  %vm1804_vm7 = vcmask 195584   ;;  %vm1806_vm8 = vcmask 228352  }
  0x6d   : > { %2175 = vmatprep.subr.bf16.mxu0 %v2567_v0  ;;  %s2575_s21 = smov 96   ;;  %s2576_s19 = smov 100  }
  0x6e   : > { %s2577_s28 = smov 64   ;;  %s2578_s15 = smov 4  }
  0x6f   : > { %s2579_s17 = smov 8   ;;  %p3095_p0 = scmp.ne.s32.totalorder %s3090_s26, 0 }
  0x70   : > { %2176 = vmatpush3.bf16.msra.mxu0 %v2365_v2 }
  0x71   : > { %2196 = vmatprep.subr.mxu0 %v2567_v0 }
  0x73   : > { %2178 = vmatmul.mubr.msk.bf16.vlgmr.msra.gmra.mrb[0].mxu0 %vm403_vm1, %v379_v4 }
  0x74   : > { %2198 = vmatprep.mubr.msk.f32.mxu0 %vm2568_vm0, %v2567_v0 }
 0x146   : > { %v441_v6 = vpop.f32.mrb[0].mxu0 }
 0x147   : > { %v2837_v7 = vadd.f32 %v2090_v5, %v441_v6  ;;  %v2179_v8 = vpop.f32.mrb[1].mxu0 }
 0x148   : > { %v444_v9 = vpop.f32.mrb[2].mxu0 }
 0x149   : > { %452 = vrot.lane.b32.xlu1 %v2837_v7, %s2569_s14  ;;  %448 = vrot.lane.b32.xlu0 %v2837_v7, %s2570_s16  ;;  %v2180_v10 = vpop.f32.mrb[3].mxu0  ;;  %s2580_s14 = smov 12   ;;  %s2581_s16 = smov 16  }
 0x14d   : > { %454 = vrot.lane.b32.xlu1 %v2837_v7, %s2571_s23  ;;  %450 = vrot.lane.b32.xlu0 %v2837_v7, %s2572_s20  ;;  %s2582_s23 = smov 20   ;;  %s2583_s20 = smov 24  }
 0x151   : > { %458 = vrot.lane.b32.xlu1 %v2837_v7, %s2573_s22  ;;  %456 = vrot.lane.b32.xlu0 %v2837_v7, %s2574_s29  ;;  %s2584_s22 = smov 28  }
 0x155   : > { %462 = vrot.lane.b32.xlu1 %v2837_v7, %s2575_s21  ;;  %460 = vrot.lane.b32.xlu0 %v2837_v7, %s2576_s19  ;;  %s376_s19 = scalar_lea.vmem [#allocation8], %s2086_s18 }
 0x1bb   : > { %v2847_v11 = vpop.permute.xlu1 %452  ;;  %v2849_v12 = vpop.permute.xlu0 %448 }
 0x1bc   : > { %539 = vrot.lane.b32.xlu0 %v2849_v12, %s2575_s21 }
 0x1bf   : > { %v2852_v13 = vpop.permute.xlu1 %454  ;;  %v2854_v14 = vpop.permute.xlu0 %450 }
 0x1c0   : > { %691 = vrot.lane.b32.xlu0 %v2847_v11, %s2575_s21  ;;  %615 = vrot.lane.b32.xlu1 %v2854_v14, %s2575_s21 }
 0x1c3   : > { %v2858_v15 = vpop.permute.xlu1 %458  ;;  %v2860_v16 = vpop.permute.xlu0 %456 }
 0x1c4   : > { %767 = vrot.lane.b32.xlu1 %v2852_v13, %s2575_s21  ;;  %843 = vrot.lane.b32.xlu0 %v2860_v16, %s2575_s21 }
 0x1c7   : > { %v463_v17 = vpop.permute.xlu1 %462  ;;  %v2864_v18 = vpop.permute.xlu0 %460 }
 0x1c8   : > { %2182 = vmatpush3.xpose.msk.msra.mxu1 %vm464_vm2, %v463_v17  ;;  %919 = vrot.lane.b32.xlu1 %v2858_v15, %s2575_s21 }
 0x1c9   : > { %995 = vrot.lane.b32.xlu0 %v2864_v18, %s2575_s21  ;;  %2186 = vmatprep.subr.mxu1 %v2567_v0  ;;  %s2129_s21 = sshll.u32 %s2657_s13, 7  ;;  %s2585_s13 = smov [#allocation8]  }
 0x1ca   : > { %s2494_s18 = sshll.u32 %s2585_s13, 4  ;;  %s2495_s18 = int_to_ptr.vmem [resolvable:$false] %s2494_s18 }
 0x1cb   : > { %2184 = vmatmul.mubr.msk.f32.vlgmr.msra.gmra.mrb[0].mxu1 %vm464_vm2, %v2837_v7 }
 0x1cc   : > { %2188 = vmatprep.mubr.msk.f32.mxu1 %vm2568_vm0, %v2567_v0 }
 0x22e   : > { %v540_v19 = vpop.permute.xlu0 %539 }
 0x22f   : > { %2187 = vmatpush3.xpose.msk.msra.mxu1 %vm464_vm2, %v540_v19 }
 0x230   : > { %2191 = vmatprep.subr.mxu1 %v2567_v0 }
 0x232   : > { %v616_v20 = vpop.permute.xlu1 %615  ;;  %2189 = vmatmul.mubr.msk.f32.vlgmr.msra.gmra.mrb[2].mxu1 %vm464_vm2, %v2849_v12  ;;  %v692_v21 = vpop.permute.xlu0 %691 }
 0x233   : > { %2192 = vmatpush3.xpose.msk.msra.mxu1 %vm464_vm2, %v616_v20  ;;  %2197 = vmatpush3.xpose.msk.msra.mxu0 %vm464_vm2, %v692_v21 }
 0x234   : > { %2193 = vmatprep.mubr.msk.f32.mxu1 %vm2568_vm0, %v2567_v0  ;;  %2201 = vmatprep.subr.mxu1 %v2567_v0 }
 0x235   : > { %2206 = vmatprep.subr.mxu0 %v2567_v0 }
 0x236   : > { %v768_v22 = vpop.permute.xlu1 %767  ;;  %2194 = vmatmul.mubr.msk.f32.vlgmr.msra.gmra.mrb[4].mxu1 %vm464_vm2, %v2854_v14  ;;  %2199 = vmatmul.mubr.msk.f32.vlgmr.msra.gmra.mrb[4].mxu0 %vm464_vm2, %v2847_v11  ;;  %v844_v23 = vpop.permute.xlu0 %843 }
 0x237   : > { %2202 = vmatpush3.xpose.msk.msra.mxu1 %vm464_vm2, %v768_v22  ;;  %2207 = vmatpush3.xpose.msk.msra.mxu0 %vm464_vm2, %v844_v23 }
 0x238   : > { %2203 = vmatprep.mubr.msk.f32.mxu1 %vm2568_vm0, %v2567_v0  ;;  %2208 = vmatprep.mubr.msk.f32.mxu0 %vm2568_vm0, %v2567_v0 }
 0x239   : > { %2211 = vmatprep.subr.mxu1 %v2567_v0  ;;  %2216 = vmatprep.subr.mxu0 %v2567_v0 }
 0x23a   : > { %v920_v24 = vpop.permute.xlu1 %919  ;;  %2204 = vmatmul.mubr.msk.f32.vlgmr.msra.gmra.mrb[6].mxu1 %vm464_vm2, %v2852_v13  ;;  %2209 = vmatmul.mubr.msk.f32.vlgmr.msra.gmra.mrb[6].mxu0 %vm464_vm2, %v2860_v16 }
 0x23b   : > { %v996_v25 = vpop.permute.xlu0 %995  ;;  %2212 = vmatpush3.xpose.msk.msra.mxu1 %vm464_vm2, %v920_v24  ;;  %2213 = vmatprep.mubr.msk.f32.mxu1 %vm2568_vm0, %v2567_v0 }
 0x23c   : > { %2217 = vmatpush3.xpose.msk.msra.mxu0 %vm464_vm2, %v996_v25  ;;  %2218 = vmatprep.mubr.msk.f32.mxu0 %vm2568_vm0, %v2567_v0 }
 0x23d   : > { %2221 = vmatprep.subr.mxu1 %v2567_v0  ;;  %2226 = vmatprep.subr.mxu0 %v2567_v0 }
 0x23e   : > { %2214 = vmatmul.mubr.msk.f32.vlgmr.msra.gmra.mrb[8].mxu1 %vm464_vm2, %v2858_v15 }
 0x23f   : > { %2219 = vmatmul.mubr.msk.f32.vlgmr.msra.gmra.mrb[8].mxu0 %vm464_vm2, %v2864_v18  ;;  %2223 = vmatprep.mubr.msk.f32.mxu1 %vm2568_vm0, %v2567_v0 }
 0x240   : > { %2228 = vmatprep.mubr.msk.f32.mxu0 %vm2568_vm0, %v2567_v0 }
 0x29e   : > { %v535_v26 = vpop.f32.mrb[0].mxu1 }
 0x29f   : > { %v2185_v27 = vpop.f32.mrb[1].mxu1  ;;  %v1072_v28 = vsel %vm1071_vm3, %v535_v26, -inf }
 0x2a0   : > { %1073 = vmax.xlane.f32.xlu1 %v1072_v28 }
 0x305   : > { %v611_v29 = vpop.f32.mrb[2].mxu1 }
 0x306   : > { %v2190_v30 = vpop.f32.mrb[3].mxu1  ;;  %v1075_v31 = vsel %vm1071_vm3, %v611_v29, -inf }
 0x307   : > { %1076 = vmax.xlane.f32.xlu0 %v1075_v31 }
 0x309   : > { %v687_v32 = vpop.f32.mrb[4].mxu1  ;;  %v763_v33 = vpop.f32.mrb[4].mxu0 }
 0x30a   : > { %v2195_v34 = vpop.f32.mrb[5].mxu1  ;;  %v2200_v35 = vpop.f32.mrb[5].mxu0  ;;  %v1078_v36 = vsel %vm1071_vm3, %v687_v32, -inf  ;;  %v1081_v37 = vsel %vm1071_vm3, %v763_v33, -inf }
 0x30b   : > { %1079 = vmax.xlane.f32.xlu0 %v1078_v36  ;;  %1082 = vmax.xlane.f32.xlu1 %v1081_v37 }
 0x30d   : > { %v839_v38 = vpop.f32.mrb[6].mxu1  ;;  %v915_v39 = vpop.f32.mrb[6].mxu0 }
 0x30e   : > { %v2205_v40 = vpop.f32.mrb[7].mxu1  ;;  %v2210_v41 = vpop.f32.mrb[7].mxu0  ;;  %v1084_v42 = vsel %vm1071_vm3, %v839_v38, -inf  ;;  %v1087_v43 = vsel %vm1071_vm3, %v915_v39, -inf }
 0x30f   : > { %1085 = vmax.xlane.f32.xlu0 %v1084_v42  ;;  %1088 = vmax.xlane.f32.xlu1 %v1087_v43 }
 0x311   : > { %v991_v44 = vpop.f32.mrb[8].mxu1 }
 0x312   : > { %v1067_v45 = vpop.f32.mrb[8].mxu0  ;;  %v2215_v46 = vpop.f32.mrb[9].mxu1  ;;  %v1090_v47 = vsel %vm1071_vm3, %v991_v44, -inf }
 0x313   : > { %v2220_v48 = vpop.f32.mrb[9].mxu0  ;;  %1091 = vmax.xlane.f32.xlu0 %v1090_v47  ;;  %v1093_v49 = vsel %vm1071_vm3, %v1067_v45, -inf }
 0x314   : > { %1094 = vmax.xlane.f32.xlu1 %v1093_v49 }
 0x325   : > { %1236 = vrot.lane.b32.xlu1 %v2849_v12, %s2577_s28 }
 0x329   : > { %1312 = vrot.lane.b32.xlu1 %v2854_v14, %s2577_s28  ;;  %1160 = vrot.lane.b32.xlu0 %v2837_v7, %s2577_s28 }
 0x32d   : > { %1464 = vrot.lane.b32.xlu1 %v2852_v13, %s2577_s28  ;;  %1388 = vrot.lane.b32.xlu0 %v2847_v11, %s2577_s28  ;;  %v1074_v50 = vpop.xlane.xlu1 %1073 }
 0x32e   : > { %v1096_v51 = vsub.f32 %v535_v26, %v1074_v50 }
 0x330   : > { %v1104_v52 = vmul.f32 1.442695, %v1096_v51 }
 0x331   : > { %1540 = vrot.lane.b32.xlu0 %v2860_v16, %s2577_s28 }
 0x332   : > { %2370 = vpow2.f32 %v1104_v52 }
 0x33c   : > { %v2936_v53 = vpop.eup %2370 }
 0x33d   : > { %v1120_v54 = vsel %vm1071_vm3, %v2936_v53, 0.0 }
 0x350   : > { %1121 = vadd.xlane.f32.xlu0 %v1120_v54 }
 0x394   : > { %v1077_v55 = vpop.xlane.xlu0 %1076 }
 0x395   : > { %v1097_v56 = vsub.f32 %v611_v29, %v1077_v55 }
 0x397   : > { %v1106_v57 = vmul.f32 1.442695, %v1097_v56 }
 0x398   : > { %v1080_v58 = vpop.xlane.xlu0 %1079  ;;  %v1083_v59 = vpop.xlane.xlu1 %1082 }
 0x399   : > { %2372 = vpow2.f32 %v1106_v57  ;;  %v1098_v60 = vsub.f32 %v687_v32, %v1080_v58  ;;  %v1099_v61 = vsub.f32 %v763_v33, %v1083_v59 }
 0x39b   : > { %v1108_v62 = vmul.f32 1.442695, %v1098_v60  ;;  %v1110_v63 = vmul.f32 1.442695, %v1099_v61 }
 0x39c   : > { %v1086_v1 = vpop.xlane.xlu0 %1085  ;;  %v1089_v2 = vpop.xlane.xlu1 %1088 }
 0x39d   : > { %2374 = vpow2.f32 %v1108_v62  ;;  %v1100_v4 = vsub.f32 %v839_v38, %v1086_v1  ;;  %v1101_v5 = vsub.f32 %v915_v39, %v1089_v2  ;;  %v2366_v62 = vld [vmem:[#allocation7] sm:$0xff]   ;;  %v2367_v2 = vld [vmem:[#allocation7 + $0x8] sm:$0xff]  }
 0x39e   : > { %2376 = vpow2.f32 %v1110_v63 }
 0x39f   : > { %v1112_v6 = vmul.f32 1.442695, %v1100_v4  ;;  %v1114_v7 = vmul.f32 1.442695, %v1101_v5 }
 0x3a0   : > { %v1092_v8 = vpop.xlane.xlu0 %1091 }
 0x3a1   : > { %2378 = vpow2.f32 %v1112_v6  ;;  %v1102_v9 = vsub.f32 %v991_v44, %v1092_v8  ;;  %v1095_v10 = vpop.xlane.xlu1 %1094 }
 0x3a2   : > { %2380 = vpow2.f32 %v1114_v7  ;;  %v1103_v11 = vsub.f32 %v1067_v45, %v1095_v10 }
 0x3a3   : > { %v2373_v12 = vpop.eup %2372  ;;  %v1116_v13 = vmul.f32 1.442695, %v1102_v9 }
 0x3a4   : > { %v1118_v14 = vmul.f32 1.442695, %v1103_v11  ;;  %v1161_v16 = vpop.permute.xlu0 %1160  ;;  %v1123_v17 = vsel %vm1071_vm3, %v2373_v12, 0.0 }
 0x3a5   : > { %2382 = vpow2.f32 %v1116_v13  ;;  %v1237_v19 = vpop.permute.xlu1 %1236  ;;  %2222 = vmatpush3.msra.mxu1 %v1161_v16  ;;  %1124 = vadd.xlane.f32.xlu1 %v1123_v17 }
 0x3a6   : > { %2384 = vpow2.f32 %v1118_v14  ;;  %2227 = vmatpush3.msra.mxu0 %v1237_v19  ;;  %2231 = vmatprep.subr.mxu1 %v2567_v0 }
 0x3a7   : > { %v2375_v20 = vpop.eup %2374  ;;  %2236 = vmatprep.subr.mxu0 %v2567_v0 }
 0x3a8   : > { %v2377_v21 = vpop.eup %2376  ;;  %v1126_v22 = vsel %vm1071_vm3, %v2375_v20, 0.0  ;;  %v1389_v32 = vpop.permute.xlu0 %1388 }
 0x3a9   : > { %1127 = vadd.xlane.f32.xlu0 %v1126_v22  ;;  %v1129_v23 = vsel %vm1071_vm3, %v2377_v21, 0.0  ;;  %v1313_v37 = vpop.permute.xlu1 %1312 }
 0x3aa   : > { %1130 = vadd.xlane.f32.xlu1 %v1129_v23 }
 0x3ab   : > { %v2379_v24 = vpop.eup %2378 }
 0x3ac   : > { %v2381_v25 = vpop.eup %2380  ;;  %v1132_v26 = vsel %vm1071_vm3, %v2379_v24, 0.0  ;;  %v1541_v33 = vpop.permute.xlu0 %1540 }
 0x3ad   : > { %1133 = vadd.xlane.f32.xlu0 %v1132_v26  ;;  %v1135_v27 = vsel %vm1071_vm3, %v2381_v25, 0.0 }
 0x3ae   : > { %1136 = vadd.xlane.f32.xlu1 %v1135_v27 }
 0x3af   : > { %v2947_v28 = vpop.eup %2382 }
 0x3b0   : > { %v2949_v29 = vpop.eup %2384  ;;  %v1138_v30 = vsel %vm1071_vm3, %v2947_v28, 0.0 }
 0x3b1   : > { %1139 = vadd.xlane.f32.xlu0 %v1138_v30  ;;  %v1141_v31 = vsel %vm1071_vm3, %v2949_v29, 0.0 }
 0x3b2   : > { %1142 = vadd.xlane.f32.xlu1 %v1141_v31 }
 0x3c3   : > { %1616 = vrot.lane.b32.xlu1 %v2858_v15, %s2577_s28  ;;  %v1465_v15 = vpop.permute.xlu1 %1464 }
 0x3c7   : > { %1692 = vrot.lane.b32.xlu0 %v2864_v18, %s2577_s28  ;;  %s1989_s28 = sshll.u32 %s376_s19, 4  ;;  %s3027_s28 = int_to_ptr.vmem [resolvable:$true] %s1989_s28 }
 0x3c8   : > { %p2497_p7 = scmp.lt.s32.totalorder %s3027_s28, %s2495_s18 }
 0x3dd   : > { %v1122_v34 = vpop.xlane.xlu0 %1121 }
 0x3de   : > { %2386 = vrcp.f32 %v1122_v34  ;;  %v2369_v34 = vld [vmem:[%s3075_s5 + $0x8] sm:$0xff]  }
 0x3e8   : > { %v2387_v35 = vpop.eup %2386 }
 0x3e9   : > { %v1152_v36 = vmul.f32 %v2387_v35, %v2936_v53  ;;  %v2118_v35 = vld [vmem:[%s3074_s4] ss:$0 sm:$0xff] }
 0x3eb   : > { %2224 = vmatmul.mubr.msk.f32.vlgmr.msra.gmra.mrb[10].mxu1 %vm1071_vm3, %v1152_v36 }
 0x3ec   : > { %2232 = vmatpush3.msra.mxu1 %v1313_v37  ;;  %2233 = vmatprep.mubr.msk.f32.mxu1 %vm2568_vm0, %v2567_v0 }
 0x3ed   : > { %2241 = vmatprep.subr.mxu1 %v2567_v0 }
 0x432   : > { %v1125_v38 = vpop.xlane.xlu1 %1124 }
 0x433   : > { %2388 = vrcp.f32 %v1125_v38 }
 0x436   : > { %v1128_v18 = vpop.xlane.xlu0 %1127 }
 0x437   : > { %2390 = vrcp.f32 %v1128_v18  ;;  %v1131_v39 = vpop.xlane.xlu1 %1130 }
 0x438   : > { %2392 = vrcp.f32 %v1131_v39 }
 0x43a   : > { %v1134_v40 = vpop.xlane.xlu0 %1133 }
 0x43b   : > { %2394 = vrcp.f32 %v1134_v40  ;;  %v1137_v41 = vpop.xlane.xlu1 %1136 }
 0x43c   : > { %2396 = vrcp.f32 %v1137_v41 }
 0x43d   : > { %v2389_v42 = vpop.eup %2388 }
 0x43e   : > { %v1153_v43 = vmul.f32 %v2389_v42, %v2373_v12  ;;  %v1140_v44 = vpop.xlane.xlu0 %1139 }
 0x43f   : > { %2398 = vrcp.f32 %v1140_v44  ;;  %v1143_v45 = vpop.xlane.xlu1 %1142 }
 0x440   : > { %2400 = vrcp.f32 %v1143_v45  ;;  %2229 = vmatmul.mubr.msk.f32.vlgmr.msra.gmra.mrb[10].mxu0 %vm1071_vm3, %v1153_v43 }
 0x441   : > { %v2391_v46 = vpop.eup %2390  ;;  %2237 = vmatpush3.msra.mxu0 %v1389_v32  ;;  %2238 = vmatprep.mubr.msk.f32.mxu0 %vm2568_vm0, %v2567_v0 }
 0x442   : > { %v2393_v47 = vpop.eup %2392  ;;  %v1154_v48 = vmul.f32 %v2391_v46, %v2375_v20  ;;  %2246 = vmatprep.subr.mxu0 %v2567_v0  ;;  %v1693_v56 = vpop.permute.xlu0 %1692 }
 0x443   : > { %v1155_v49 = vmul.f32 %v2393_v47, %v2377_v21  ;;  %v1617_v54 = vpop.permute.xlu1 %1616 }
 0x444   : > { %2234 = vmatmul.mubr.msk.f32.vlgmr.msra.gmra.mrb[12].mxu1 %vm1071_vm3, %v1154_v48 }
 0x445   : > { %v2395_v50 = vpop.eup %2394  ;;  %2239 = vmatmul.mubr.msk.f32.vlgmr.msra.gmra.mrb[12].mxu0 %vm1071_vm3, %v1155_v49  ;;  %2242 = vmatpush3.msra.mxu1 %v1465_v15 }
 0x446   : > { %v2397_v51 = vpop.eup %2396  ;;  %v1156_v52 = vmul.f32 %v2395_v50, %v2379_v24  ;;  %2247 = vmatpush3.msra.mxu0 %v1541_v33  ;;  %2243 = vmatprep.mubr.msk.f32.mxu1 %vm2568_vm0, %v2567_v0  ;;  %v2368_v33 = vld [vmem:[%s3075_s5] sm:$0xff]  }
 0x447   : > { %v1157_v53 = vmul.f32 %v2397_v51, %v2381_v25  ;;  %2248 = vmatprep.mubr.msk.f32.mxu0 %vm2568_vm0, %v2567_v0  ;;  %2251 = vmatprep.subr.mxu1 %v2567_v0 }
 0x448   : > { %2256 = vmatprep.subr.mxu0 %v2567_v0  ;;  %2244 = vmatmul.mubr.msk.f32.vlgmr.msra.gmra.mrb[14].mxu1 %vm1071_vm3, %v1156_v52 }
 0x449   : > { %v2399_v55 = vpop.eup %2398  ;;  %2249 = vmatmul.mubr.msk.f32.vlgmr.msra.gmra.mrb[14].mxu0 %vm1071_vm3, %v1157_v53  ;;  %2252 = vmatpush3.msra.mxu1 %v1617_v54 }
 0x44a   : > { %v2401_v57 = vpop.eup %2400  ;;  %v1158_v58 = vmul.f32 %v2399_v55, %v2947_v28  ;;  %2257 = vmatpush3.msra.mxu0 %v1693_v56  ;;  %2253 = vmatprep.mubr.msk.f32.mxu1 %vm2568_vm0, %v2567_v0  ;;  %v2126_v56 = vld [vmem:[%s3077_s7] ss:$0 sm:$0xff] }
 0x44b   : > { %v1159_v59 = vmul.f32 %v2401_v57, %v2949_v29  ;;  %2258 = vmatprep.mubr.msk.f32.mxu0 %vm2568_vm0, %v2567_v0  ;;  %2261 = vmatprep.subr.bf16.mxu1 %v2567_v0 }
 0x44c   : > { %2254 = vmatmul.mubr.msk.f32.vlgmr.msra.gmra.mrb[16].mxu1 %vm1071_vm3, %v1158_v58  ;;  %2269 = vmatprep.subr.bf16.mxu0 %v2567_v0  ;;  %v2127_v58 = vld [vmem:[%s3078_s8] ss:$0 sm:$0xff] }
 0x44d   : > { %2259 = vmatmul.mubr.msk.f32.vlgmr.msra.gmra.mrb[16].mxu0 %vm1071_vm3, %v1159_v59  ;;  %2265 = vmatprep.mubr.msk.bf16.mxu1 %vm2568_vm0, %v2567_v0 }
 0x44e   : > { %2273 = vmatprep.mubr.msk.bf16.mxu0 %vm2568_vm0, %v2567_v0  ;;  %2262 = vmatpush3.bf16.msra.mxu1 %v2366_v62 }
 0x44f   : > { %2263 = vmatprep.subr.bf16.mxu1 %v2567_v0  ;;  %2270 = vmatpush3.bf16.msra.mxu0 %v2368_v33 }
 0x450   : > { %2271 = vmatprep.subr.bf16.mxu0 %v2567_v0  ;;  %v2122_v0 = vld [vmem:[%s3076_s6] ss:$0 sm:$0xff] }
 0x452   : > { %2264 = vmatpush3.bf16.msra.mxu1 %v2367_v2 }
 0x453   : > { %2272 = vmatpush3.bf16.msra.mxu0 %v2369_v34 }
 0x4be   : > { %v1232_v60 = vpop.f32.mrb[10].mxu1 }
 0x4bf   : > { %v2225_v61 = vpop.f32.mrb[11].mxu1 }
 0x513   : > { %v1308_v63 = vpop.f32.mrb[10].mxu0 }
 0x514   : > { %1769 = vrot.lane.b32.xlu1 %v1308_v63, %s2578_s15  ;;  %v2230_v1 = vpop.f32.mrb[11].mxu0 }
 0x517   : > { %v1384_v4 = vpop.f32.mrb[12].mxu1 }
 0x518   : > { %v1460_v5 = vpop.f32.mrb[12].mxu0  ;;  %1773 = vrot.lane.b32.xlu0 %v1384_v4, %s2579_s17  ;;  %v2235_v6 = vpop.f32.mrb[13].mxu1 }
 0x519   : > { %1777 = vrot.lane.b32.xlu1 %v1460_v5, %s2580_s14  ;;  %v2240_v7 = vpop.f32.mrb[13].mxu0  ;;  %s3025_s14 = scalar_lea.hbm %s3079_s9, %s2129_s21 }
 0x51b   : > { %v1536_v8 = vpop.f32.mrb[14].mxu1 }
 0x51c   : > { %v1612_v9 = vpop.f32.mrb[14].mxu0  ;;  %1781 = vrot.lane.b32.xlu0 %v1536_v8, %s2581_s16  ;;  %v2245_v10 = vpop.f32.mrb[15].mxu1  ;;  %s1976_s16 = scalar_lea.sflag [#allocation4], %s2805_s25 }
 0x51d   : > { %1785 = vrot.lane.b32.xlu1 %v1612_v9, %s2582_s23  ;;  %v2250_v11 = vpop.f32.mrb[15].mxu0  ;;  %s2490_s23 = scalar_lea.vmem %s3027_s28, 128 }
 0x51e   : > { %p2491_p11 = scmp.ne.s32.totalorder %s3027_s28, %s2490_s23 }
 0x51f   : > { %v1688_v12 = vpop.f32.mrb[16].mxu1 }
 0x520   : > { %v1764_v13 = vpop.f32.mrb[16].mxu0  ;;  %1789 = vrot.lane.b32.xlu0 %v1688_v12, %s2583_s20  ;;  %v2255_v14 = vpop.f32.mrb[17].mxu1  ;;  %p2492_p1 = pnand %p2491_p11, %p3095_p0  ;;  %s2496_s20 = scalar_lea.vmem %s2495_s18, 256 }
 0x521   : > { %1793 = vrot.lane.b32.xlu1 %v1764_v13, %s2584_s22  ;;  %v2260_v16 = vpop.f32.mrb[17].mxu0  ;;  %p2498_p9 = scmp.lt.s32.totalorder %s2496_s20, %s2490_s23 }
 0x522   : > { %p2493_p3 = pneg %p2492_p1 }
 0x523   : > { %p2499_p12 = por %p2498_p9, %p2497_p7 }
 0x525   : > { %p2500_p2 = pnand %p2499_p12, %p2493_p3 }
 0x586   : > { %v1770_v17 = vpop.permute.xlu1 %1769 }
 0x587   : > { %v1796_v19 = vsel %vm464_vm2, %v1232_v60, %v1770_v17 }
 0x58a   : > { %v1774_v20 = vpop.permute.xlu0 %1773 }
 0x58b   : > { %v1797_v21 = vsel %vm1071_vm3, %v1796_v19, %v1774_v20  ;;  %v1778_v22 = vpop.permute.xlu1 %1777 }
 0x58c   : > { %v1799_v23 = vsel %vm1798_vm4, %v1797_v21, %v1778_v22 }
 0x58e   : > { %v1782_v24 = vpop.permute.xlu0 %1781 }
 0x58f   : > { %v1801_v25 = vsel %vm1800_vm5, %v1799_v23, %v1782_v24  ;;  %v1786_v26 = vpop.permute.xlu1 %1785 }
 0x590   : > { %v1803_v27 = vsel %vm1802_vm6, %v1801_v25, %v1786_v26 }
 0x592   : > { %v1790_v28 = vpop.permute.xlu0 %1789 }
 0x593   : > { %v1805_v29 = vsel %vm1804_vm7, %v1803_v27, %v1790_v28  ;;  %v1794_v30 = vpop.permute.xlu1 %1793 }
 0x594   : > { %v1807_v31 = vsel %vm1806_vm8, %v1805_v29, %v1794_v30 }
 0x595   : > { %v1808_v32 = vpack.c.bf16 %v1807_v31, %v1807_v31 }
 0x597   : > { %2266 = vmatmul.mubr.msk.bf16.vlgmr.msra.gmra.mrb[20].mxu1 %vm403_vm1, %v1808_v32 }
 0x66a   : > { %v1869_v36 = vpop.f32.mrb[20].mxu1 }
 0x66b   : > { %v1870_v37 = vadd.f32 %v2118_v35, %v1869_v36  ;;  %v2267_v15 = vpop.f32.mrb[21].mxu1 }
 0x66c   : > { %v1872_v38 = vpop.f32.mrb[22].mxu1 }
 0x66d   : > { %v1875_v18 = vadd.f32 %v1870_v37, %v2825_v3  ;;  %v2268_v39 = vpop.f32.mrb[23].mxu1 }
 0x66f   : > { %v1876_v40 = vpack.c.bf16 %v1875_v18, %v1875_v18 }
 0x671   : > { %2274 = vmatmul.mubr.msk.bf16.vlgmr.msra.gmra.mrb[20].mxu0 %vm403_vm1, %v1876_v40 }
 0x744   : > { %v1937_v41 = vpop.f32.mrb[20].mxu0 }
 0x745   : > { %v1938_v42 = vadd.f32 %v2122_v0, %v1937_v41  ;;  %v2275_v43 = vpop.f32.mrb[21].mxu0 }
 0x746   : > { %v1940_v44 = vpop.f32.mrb[22].mxu0 }
 0x747   : > { %v2276_v45 = vpop.f32.mrb[23].mxu0  ;;  %v1943_v46 = vadd.f32 %v1938_v42, %v1875_v18 }
 0x749   : > { %v1944_v47 = vsel %vm403_vm1, %v1943_v46, 0.0 }
 0x74a   : > { %1945 = vadd.xlane.f32.xlu0 %v1944_v47 }
 0x7d7   : > { %v1946_v3 = vpop.xlane.xlu0 %1945 }
 0x7d8   : > { %v1948_v48 = vmul.f32 0.03125, %v1946_v3 }
 0x7da   : > { %v1949_v49 = vsub.f32 %v1943_v46, %v1948_v48 }
 0x7dc   : > { %v1950_v50 = vmul.f32 %v1949_v49, %v1949_v49 }
 0x7de   : > { %v1951_v51 = vsel %vm403_vm1, %v1950_v50, 0.0 }
 0x7df   : > { %1952 = vadd.xlane.f32.xlu1 %v1951_v51 }
 0x86c   : > { %v1953_v52 = vpop.xlane.xlu1 %1952 }
 0x86d   : > { %v1954_v53 = vmul.f32 0.03125, %v1953_v52 }
 0x86f   : > { %v1955_v54 = vadd.f32 1e-05, %v1954_v53 }
 0x871   : > { %2402 = vrsqrt.f32 %v1955_v54 }
 0x87b   : > { %v2403_v55 = vpop.eup %2402 }
 0x87c   : > { %v1957_v57 = vmul.f32 %v2403_v55, %v1949_v49 }
 0x87e   : > { %v1965_v59 = vmul.f32 %v2126_v56, %v1957_v57 }
 0x880   : > { %v1973_v60 = vadd.f32 %v2127_v58, %v1965_v59 }
 0x882   : > { %1974 = vst.msk [vmem:[%s376_s19] sm:$0xff] %vm403_vm1, %v1973_v60 }
 0x883   : > { %2503 = shalt.err (!%p2500_p2)
}
 0x884   : > { %s2504_s25 = scalar_lea.hbm %s3025_s14, 128  ;;  %s2508_s21 = scalar_lea.hbm %s3079_s9, 256 }
 0x885   : > { %p2505_p13 = scmp.ne.s32.totalorder %s3025_s14, %s2504_s25  ;;  %p2509_p4 = scmp.lt.u32.totalorder %s3025_s14, %s3079_s9 }
 0x886   : > { %p2510_p5 = scmp.lt.u32.totalorder %s2508_s21, %s2504_s25  ;;  %p2512_p11 = scmp.lt.u32.totalorder %s2504_s25, %s3025_s14 }
 0x887   : > { %p2506_p6 = pnand %p2505_p13, %p3095_p0 }
 0x888   : > { %p2511_p8 = por %p2510_p5, %p2509_p4 }
 0x889   : > { %p2507_p10 = pneg %p2506_p6 }
 0x88a   : > { %p2513_p1 = por %p2512_p11, %p2511_p8 }
 0x88c   : > { %p2514_p3 = pnand %p2513_p1, %p2507_p10 }
 0x88e   : > { %2517 = shalt.err (!%p2514_p3)
}
 0x88f   : > { %2287 = dma.vmem_to_hbm [thread:$0]  (%p3095_p0), %s3027_s28, 128, %s3025_s14, %s1976_s16  }
 0x890 PF: > { %s3096_s17 = sld [smem:[#allocation12_spill]]  ;;  %s2001_s23 = sand.u32 1, %s2548_s30  }
 0x891   : > { %p3098_p9 = scmp.ge.s32.totalorder %s2560_s12, 2  ;;  %s2002_s13 = scalar_lea.sflag [#allocation4], %s2001_s23 }
 0x896   : > { %p3097_p7 = scmp.ne.s32.totalorder %s3096_s17, 0 }
 0x898   : > { %p2301_p12 = pnand %p3098_p9, %p3097_p7 }
 0x89a   : > { %2543 = dma.done.wait (!%p2301_p12), %s2002_s13, 128  }
 0x89b   : > { %2545 = vsyncadd (!%p2301_p12), %s2002_s13, 4294967168  ;;  %p23_p2 = scmp.ge.s32.totalorder %s2746_s24, 4   ;;  %s3099_s30 = smov %s2552_s10 }
 0x89c   : > { %s3100_s10 = smov %s2556_s11  ;;  %s3101_s11 = smov %s2762_s27 }
 0x89d   : > { %s3102_s12 = smov %s2746_s24  ;;  %25 = sbr.rel (!%p23_p2) target bundleno = 6 (0x6), region = 109 }
 0x8a4   :  { %2007 = vsyncpa [#allocation3], 1 }
 0x8a5   :  { %2009 = vsyncpa [#allocation3 + $0x1], 1 }
 0x8a6   :  { %2010 = vsyncpa [#allocation6], 1 }
 0x8a7   :  { %2011 = vsyncpa [#allocation4], 1 }
 0x8a8   :  { %2013 = vsyncpa [#allocation4 + $0x1], 1 }

</bundles_post_ra>
